<compile_context>
chip_gen: v6e
topology: v6e:2x2x1
jax: 0.10.0
libtpu: 0.0.40
codegen_flags: <defaults>
</compile_context>

<pallas_src>
import jax
import jax.numpy as jnp
from jax.experimental import pallas as pl
from jax.experimental.pallas import tpu as pltpu

LANE = 128
SUBLANE = 8


def _make_mlp_kernel(n_layers, in_dim, chunk, n_chunks):
    """Fused MLP kernel body.

    Kernel args: (x_ref, w0, b0, w1, b1, ..., o_ref).
      x_ref : (in_dim, tile)     activations, batch on lanes
      w_i   : (out_i, in_i)      = PyTorch weight (out, in), out_i sublane-padded
      b_i   : (out_i, 1)
      o_ref : (tile, out_last)   output already in (batch, features) layout
    """

    def kernel(*refs):
        x_ref = refs[0]
        o_ref = refs[-1]
        wb = refs[1:-1]

        # Tiny weights: load once, stay resident across the chunk loop.
        ws = [wb[2 * i][...] for i in range(n_layers)]
        bs = [wb[2 * i + 1][...] for i in range(n_layers)]

        def compute_chunk(off):
            xc = x_ref[:, pl.ds(off, chunk)]                # (in_dim, C)

            # Layer 0: contraction depth = 2 -> broadcast FMAs on the VPU.
            acc = bs[0]                                     # (h0, 1), lane-bcast
            for k in range(in_dim):
                acc = acc + ws[0][:, k:k + 1] * xc[k:k + 1, :]
            h = jnp.tanh(acc)                               # (h0, C)

            # Remaining layers: MXU matmul (f32 acc) + bias (VPU) + tanh (EUP).
            for i in range(1, n_layers):
                h = jnp.tanh(
                    jnp.dot(ws[i], h, preferred_element_type=jnp.float32)
                    + bs[i]
                )

            # Transpose (out, C) -> (C, out) on the XLU (hidden under the
            # EUP-bound tanh work) so no wrapper-side transpose is needed.
            o_ref[pl.ds(off, chunk), :] = h.T.astype(o_ref.dtype)

        if n_chunks == 1:
            compute_chunk(0)
        else:
            @pl.loop(0, n_chunks)
            def _(c):
                compute_chunk(pl.multiple_of(c * chunk, chunk))

    return kernel


def encoder_forward(x, params, *, batch_tile=32768, lane_chunk=512):
    """Run the fused encoder MLP as a single Pallas call.

    x:      (batch, 2) float32
    params: list of (W, b) with W: (in, out), b: (1, out) or (out,)
    Returns (batch, out_dim) float32, matching PyTorch `net(x)`.
    """
    x = jnp.asarray(x, jnp.float32)
    batch, in_dim = x.shape
    n_layers = len(params)
    out_dim = params[-1][0].shape[1]

    # ---- tiling -----------------------------------------------------------
    chunk = max(LANE, (min(lane_chunk, batch_tile) // LANE) * LANE)
    n_chunks_total = max(1, pl.cdiv(batch, chunk))
    chunks_per_tile = max(1, batch_tile // chunk)
    n_steps = pl.cdiv(n_chunks_total, chunks_per_tile)
    # v7x: make sure the "parallel" grid axis has >= 2 steps to shard across
    # its two TensorCores whenever there is enough work.
    if n_steps < 2 and n_chunks_total >= 2:
        n_steps = 2
    chunks_per_tile = pl.cdiv(n_chunks_total, n_steps)
    tile = chunks_per_tile * chunk
    b_pad = n_steps * tile

    # ---- operands (layout plumbing) ----------------------------------------
    # Batch onto the lane axis, zero-padded to the grid extent.
    x_t = jnp.pad(x.T, ((0, 0), (0, b_pad - batch)))        # (in_dim, b_pad)
    flat_inputs = [x_t]
    in_specs = [pl.BlockSpec((in_dim, tile), lambda i: (0, i))]

    dims_p = [in_dim]
    prev_p = in_dim
    for w, b in params:
        w = jnp.asarray(w, jnp.float32)                      # (in, out)
        b = jnp.asarray(b, jnp.float32).reshape(-1)          # (out,)
        out_d = w.shape[1]
        out_p = pl.cdiv(out_d, SUBLANE) * SUBLANE            # sublane-align
        wt = jnp.zeros((out_p, prev_p), jnp.float32)
        wt = wt.at[:out_d, :w.shape[0]].set(w.T)             # (out_p, in_p)
        bt = jnp.zeros((out_p, 1), jnp.float32).at[:out_d, 0].set(b)
        flat_inputs += [wt, bt]
        # Tiny weights: full-array VMEM blocks, resident across the grid.
        in_specs.append(pl.BlockSpec((out_p, prev_p), lambda i: (0, 0)))
        in_specs.append(pl.BlockSpec((out_p, 1), lambda i: (0, 0)))
        dims_p.append(out_p)
        prev_p = out_p

    out_p_last = dims_p[-1]

    cost = pl.CostEstimate(
        flops=2 * b_pad * sum(dims_p[i] * dims_p[i + 1] for i in range(n_layers)),
        transcendentals=b_pad * sum(dims_p[1:]),
        bytes_accessed=4 * (b_pad * (dims_p[0] + out_p_last)
                            + sum(int(a.size) for a in flat_inputs[1:])),
    )

    out = pl.pallas_call(
        _make_mlp_kernel(n_layers, in_dim, chunk, chunks_per_tile),
        out_shape=jax.ShapeDtypeStruct((b_pad, out_p_last), jnp.float32),
        grid=(n_steps,),
        in_specs=in_specs,
        out_specs=pl.BlockSpec((tile, out_p_last), lambda i: (i, 0)),
        compiler_params=pltpu.CompilerParams(
            dimension_semantics=("parallel",)),
        cost_estimate=cost,
    )(*flat_inputs)

    # Padded rows / feature columns sliced off (identity when nothing padded).
    return out[:batch, :out_dim]


def init_encoder_params(key, hidden_sizes):
    """Deterministic synthetic parameters matching encoder(hidden_sizes)."""
    dims = [2] + list(hidden_sizes)
    params = []
    for i in range(len(dims) - 1):
        key, kw, kb = jax.random.split(key, 3)
        fan_in, fan_out = dims[i], dims[i + 1]
        bound = 1.0 / jnp.sqrt(jnp.float32(fan_in))
        w = jax.random.uniform(
            kw, (fan_in, fan_out), jnp.float32, minval=-bound, maxval=bound
        )
        b = jax.random.uniform(
            kb, (1, fan_out), jnp.float32, minval=-bound, maxval=bound
        )
        params.append((w, b))
    return params


def encoder_reference(x, params):
    """Plain-JAX reference of the PyTorch forward."""
    h = x
    for w, b in params:
        h = jnp.tanh(h @ w + b.reshape(1, -1))
    return h


if __name__ == "__main__":
    key = jax.random.PRNGKey(0)
    hidden_sizes = [32, 32, 16]          # dims 2 -> 32 -> 32 -> 16

    # Case 1: tiny batch, default tiling (grid = 1, single chunk).
    key, kx = jax.random.split(key)
    x = jax.random.normal(kx, (8, 2), jnp.float32)
    params = init_encoder_params(key, hidden_sizes)
    out = jax.block_until_ready(encoder_forward(x, params))
    ref = encoder_reference(x, params)
    assert out.shape == (8, hidden_sizes[-1])
    assert jnp.allclose(out, ref, atol=1e-5, rtol=1e-5)

    # Case 2: padded multi-step grid (batch=200, 128-lane chunks -> grid of 2).
    key, kx2 = jax.random.split(key)
    x2 = jax.random.normal(kx2, (200, 2), jnp.float32)
    out2 = jax.block_until_ready(
        encoder_forward(x2, params, batch_tile=128, lane_chunk=128))
    ref2 = encoder_reference(x2, params)
    assert out2.shape == (200, hidden_sizes[-1])
    assert jnp.allclose(out2, ref2, atol=1e-5, rtol=1e-5)

    # Case 3: multi-chunk inner loop (grid of 2, 2 chunks of 256 lanes each).
    key, kx3 = jax.random.split(key)
    x3 = jax.random.normal(kx3, (1024, 2), jnp.float32)
    out3 = jax.block_until_ready(
        encoder_forward(x3, params, batch_tile=512, lane_chunk=256))
    ref3 = encoder_reference(x3, params)
    assert out3.shape == (1024, hidden_sizes[-1])
    assert jnp.allclose(out3, ref3, atol=1e-5, rtol=1e-5)

    print("KERNEL_OK")
</pallas_src>

<mosaic_0001>
module attributes {stable_mosaic.version = 11 : i64} {
  func.func @kernel(%arg0: i32, %arg1: memref<2x512xf32, #tpu.memory_space<vmem>>, %arg2: memref<32x2xf32, #tpu.memory_space<vmem>>, %arg3: memref<32x1xf32, #tpu.memory_space<vmem>>, %arg4: memref<32x32xf32, #tpu.memory_space<vmem>>, %arg5: memref<32x1xf32, #tpu.memory_space<vmem>>, %arg6: memref<16x32xf32, #tpu.memory_space<vmem>>, %arg7: memref<16x1xf32, #tpu.memory_space<vmem>>, %arg8: memref<512x16xf32, #tpu.memory_space<vmem>>) attributes {dimension_semantics = [#tpu.dimension_semantics<parallel>], iteration_bounds = array<i64: 1>, scalar_prefetch = 0 : i64, scratch_operands = 0 : i64, tpu.core_type = #tpu.core_type<tc>, window_params = [{transform_indices = @transform_0, window_bounds = array<i64: 2, 512>}, {pipeline_mode = #tpu.pipeline_mode<synchronous>, transform_indices = @transform_1, window_bounds = array<i64: 32, 2>}, {pipeline_mode = #tpu.pipeline_mode<synchronous>, transform_indices = @transform_2, window_bounds = array<i64: 32, 1>}, {pipeline_mode = #tpu.pipeline_mode<synchronous>, transform_indices = @transform_3, window_bounds = array<i64: 32, 32>}, {pipeline_mode = #tpu.pipeline_mode<synchronous>, transform_indices = @transform_4, window_bounds = array<i64: 32, 1>}, {pipeline_mode = #tpu.pipeline_mode<synchronous>, transform_indices = @transform_5, window_bounds = array<i64: 16, 32>}, {pipeline_mode = #tpu.pipeline_mode<synchronous>, transform_indices = @transform_6, window_bounds = array<i64: 16, 1>}, {transform_indices = @transform_7, window_bounds = array<i64: 512, 16>}]} {
    %c0 = arith.constant 0 : index
    %c0_0 = arith.constant 0 : index
    %0 = vector.load %arg2[%c0, %c0_0] : memref<32x2xf32, #tpu.memory_space<vmem>>, vector<32x2xf32>
    %c0_1 = arith.constant 0 : index
    %c0_2 = arith.constant 0 : index
    %1 = vector.load %arg4[%c0_1, %c0_2] : memref<32x32xf32, #tpu.memory_space<vmem>>, vector<32x32xf32>
    %c0_3 = arith.constant 0 : index
    %c0_4 = arith.constant 0 : index
    %2 = vector.load %arg6[%c0_3, %c0_4] : memref<16x32xf32, #tpu.memory_space<vmem>>, vector<16x32xf32>
    %c0_5 = arith.constant 0 : index
    %c0_6 = arith.constant 0 : index
    %3 = vector.load %arg3[%c0_5, %c0_6] : memref<32x1xf32, #tpu.memory_space<vmem>>, vector<32x1xf32>
    %c0_7 = arith.constant 0 : index
    %c0_8 = arith.constant 0 : index
    %4 = vector.load %arg5[%c0_7, %c0_8] : memref<32x1xf32, #tpu.memory_space<vmem>>, vector<32x1xf32>
    %c0_9 = arith.constant 0 : index
    %c0_10 = arith.constant 0 : index
    %5 = vector.load %arg7[%c0_9, %c0_10] : memref<16x1xf32, #tpu.memory_space<vmem>>, vector<16x1xf32>
    %c0_11 = arith.constant 0 : index
    %c0_12 = arith.constant 0 : index
    %6 = vector.load %arg1[%c0_11, %c0_12] : memref<2x512xf32, #tpu.memory_space<vmem>>, vector<2x512xf32>
    %7 = vector.extract_strided_slice %0 {offsets = [0, 0], sizes = [32, 1], strides = [1, 1]} : vector<32x2xf32> to vector<32x1xf32>
    %8 = vector.extract_strided_slice %6 {offsets = [0, 0], sizes = [1, 512], strides = [1, 1]} : vector<2x512xf32> to vector<1x512xf32>
    %9 = vector.broadcast %7 : vector<32x1xf32> to vector<32x512xf32>
    %10 = vector.broadcast %8 : vector<1x512xf32> to vector<32x512xf32>
    %11 = arith.mulf %9, %10 : vector<32x512xf32>
    %12 = vector.broadcast %3 : vector<32x1xf32> to vector<32x512xf32>
    %13 = arith.addf %12, %11 : vector<32x512xf32>
    %14 = vector.extract_strided_slice %0 {offsets = [0, 1], sizes = [32, 1], strides = [1, 1]} : vector<32x2xf32> to vector<32x1xf32>
    %15 = vector.extract_strided_slice %6 {offsets = [1, 0], sizes = [1, 512], strides = [1, 1]} : vector<2x512xf32> to vector<1x512xf32>
    %16 = vector.broadcast %14 : vector<32x1xf32> to vector<32x512xf32>
    %17 = vector.broadcast %15 : vector<1x512xf32> to vector<32x512xf32>
    %18 = arith.mulf %16, %17 : vector<32x512xf32>
    %19 = arith.addf %13, %18 : vector<32x512xf32>
    %20 = math.tanh %19 : vector<32x512xf32>
    %cst = arith.constant dense<0.000000e+00> : vector<32x512xf32>
    %21 = tpu.matmul %1, %20, %cst {dimension_numbers = #tpu.dot_dimension_numbers<[1], [0], [0], [1], [0, 0, 1, 1], [], []>} : vector<32x32xf32>, vector<32x512xf32>, vector<32x512xf32> -> vector<32x512xf32>
    %22 = vector.broadcast %4 : vector<32x1xf32> to vector<32x512xf32>
    %23 = arith.addf %21, %22 : vector<32x512xf32>
    %24 = math.tanh %23 : vector<32x512xf32>
    %cst_13 = arith.constant dense<0.000000e+00> : vector<16x512xf32>
    %25 = tpu.matmul %2, %24, %cst_13 {dimension_numbers = #tpu.dot_dimension_numbers<[1], [0], [0], [1], [0, 0, 1, 1], [], []>} : vector<16x32xf32>, vector<32x512xf32>, vector<16x512xf32> -> vector<16x512xf32>
    %26 = vector.broadcast %5 : vector<16x1xf32> to vector<16x512xf32>
    %27 = arith.addf %25, %26 : vector<16x512xf32>
    %28 = math.tanh %27 : vector<16x512xf32>
    %29 = tpu.transpose %28, [1, 0] : vector<16x512xf32> -> vector<512x16xf32>
    %c0_14 = arith.constant 0 : index
    %c0_15 = arith.constant 0 : index
    %30 = vector.load %arg8[%c0_14, %c0_15] : memref<512x16xf32, #tpu.memory_space<vmem>>, vector<512x16xf32>
    tpu.vector_store %arg8[%c0_14, %c0_15], %29 {strides = array<i32>} : memref<512x16xf32, #tpu.memory_space<vmem>>, vector<512x16xf32>,
    return
  }
  func.func @transform_0(%arg0: i32) -> (i32, i32) {
    %c0_i32 = arith.constant 0 : i32
    %c0_i32_0 = arith.constant 0 : i32
    return %c0_i32, %arg0 : i32, i32
  }
  func.func @transform_1(%arg0: i32) -> (i32, i32) {
    %c0_i32 = arith.constant 0 : i32
    %c0_i32_0 = arith.constant 0 : i32
    %c0_i32_1 = arith.constant 0 : i32
    return %c0_i32, %c0_i32_0 : i32, i32
  }
  func.func @transform_2(%arg0: i32) -> (i32, i32) {
    %c0_i32 = arith.constant 0 : i32
    %c0_i32_0 = arith.constant 0 : i32
    %c0_i32_1 = arith.constant 0 : i32
    return %c0_i32, %c0_i32_0 : i32, i32
  }
  func.func @transform_3(%arg0: i32) -> (i32, i32) {
    %c0_i32 = arith.constant 0 : i32
    %c0_i32_0 = arith.constant 0 : i32
    %c0_i32_1 = arith.constant 0 : i32
    return %c0_i32, %c0_i32_0 : i32, i32
  }
  func.func @transform_4(%arg0: i32) -> (i32, i32) {
    %c0_i32 = arith.constant 0 : i32
    %c0_i32_0 = arith.constant 0 : i32
    %c0_i32_1 = arith.constant 0 : i32
    return %c0_i32, %c0_i32_0 : i32, i32
  }
  func.func @transform_5(%arg0: i32) -> (i32, i32) {
    %c0_i32 = arith.constant 0 : i32
    %c0_i32_0 = arith.constant 0 : i32
    %c0_i32_1 = arith.constant 0 : i32
    return %c0_i32, %c0_i32_0 : i32, i32
  }
  func.func @transform_6(%arg0: i32) -> (i32, i32) {
    %c0_i32 = arith.constant 0 : i32
    %c0_i32_0 = arith.constant 0 : i32
    %c0_i32_1 = arith.constant 0 : i32
    return %c0_i32, %c0_i32_0 : i32, i32
  }
  func.func @transform_7(%arg0: i32) -> (i32, i32) {
    %c0_i32 = arith.constant 0 : i32
    %c0_i32_0 = arith.constant 0 : i32
    return %arg0, %c0_i32 : i32, i32
  }
}

</mosaic_0001>

<bundles_post_ra>
// kernel: tpu_custom_call.1
= control target key start
LH: loop header
LB: loop body
LE: loop exit
PB: predicated region body
PF: predicated region fallthrough
CT: control target
= control target key end

     0   :  { %v959_v0 = vmov 0   ;;  %v960_v4 = vmov 1   ;;  %v961_v14 = vmov 0.0   ;;  %v68_v17 = vlaneseq  ;;  %s1381_s2 = inlined_call_operand.vmem [shape: f32[32,1], index: 2, kind: input, shape index: {}]   ;;  %s1382_s1 = inlined_call_operand.vmem [shape: f32[32,2], index: 1, kind: input, shape index: {}]   ;;  %s1383_s4 = inlined_call_operand.vmem [shape: f32[32,1], index: 4, kind: input, shape index: {}]   ;;  %s1384_s6 = inlined_call_operand.vmem [shape: f32[16,1], index: 6, kind: input, shape index: {}]   ;;  %s1385_s0 = inlined_call_operand.vmem [shape: f32[2,512], index: 0, kind: input, shape index: {}]   ;;  %s1386_s3 = inlined_call_operand.vmem [shape: f32[32,32], index: 3, kind: input, shape index: {}]   ;;  %s1387_s5 = inlined_call_operand.vmem [shape: f32[16,32], index: 5, kind: input, shape index: {}]   ;;  %s1388_s7 = inlined_call_operand.vmem [shape: f32[512,16], index: 7, kind: output, shape index: {}]  }
   0x1   :  { %874 = vset.pattern.permute.xlu1 %v959_v0  ;;  %873 = vset.pattern.permute.xlu0 %v959_v0  ;;  %v39_v1 = vld [vmem:[%s1381_s2 + $0x18] sm:$0xff]  ;;  %v28_v3 = vld [vmem:[%s1382_s1 + $0x10] sm:$0xff]  ;;  %v27_v5 = vld [vmem:[%s1382_s1 + $0x8] sm:$0xff]  ;;  %vm276_vm0 = vcmask 261120   ;;  %vm789_vm1 = vcmask 130048  }
   0x2   :  { %v29_v2 = vld [vmem:[%s1382_s1 + $0x18] sm:$0xff]  ;;  %137 = vperm.xlu1 %874, %v39_v1   ;;  %v38_v6 = vld [vmem:[%s1381_s2 + $0x10] sm:$0xff]  ;;  %v26_v7 = vld [vmem:[%s1382_s1] sm:$0xff]  ;;  %353 = vmatprep.mubr.f32.mxu0 %v961_v14  ;;  %v69_v18 = vshrl.u32 %v68_v17, 7 }
   0x3   :  { %64 = vperm.xlu0 %873, %v29_v2   ;;  %v37_v8 = vld [vmem:[%s1381_s2 + $0x8] sm:$0xff]  ;;  %v36_v9 = vld [vmem:[%s1381_s2] sm:$0xff]  ;;  %v43_v10 = vld [vmem:[%s1383_s4 + $0x18] sm:$0xff]  ;;  %442 = vmatprep.mubr.f32.mxu1 %v961_v14 }
   0x4   :  { %v41_v11 = vld [vmem:[%s1383_s4 + $0x8] sm:$0xff]  ;;  %v40_v12 = vld [vmem:[%s1383_s4] sm:$0xff]  ;;  %v42_v15 = vld [vmem:[%s1383_s4 + $0x10] sm:$0xff]  ;;  %v70_v19 = vsub.s32 0, %v69_v18  ;;  %v74_v20 = vsub.s32 2, %v69_v18  ;;  %v78_v21 = vsub.s32 4, %v69_v18 }
   0x5   :  { %v45_v13 = vld [vmem:[%s1384_s6 + $0x8] sm:$0xff]  ;;  %v44_v16 = vld [vmem:[%s1384_s6] sm:$0xff]  ;;  %v82_v23 = vsub.s32 6, %v69_v18  ;;  %v174_v27 = vsub.s32 1, %v69_v18  ;;  %v182_v28 = vsub.s32 5, %v69_v18  ;;  %v178_v29 = vsub.s32 3, %v69_v18 }
   0x6   :  { %875 = vset.pattern.permute.xlu1 %v960_v4  ;;  %v46_v22 = vld [vmem:[%s1385_s0] sm:$0xff]  ;;  %v186_v30 = vsub.s32 7, %v69_v18 }
   0x7   :  { %59 = vperm.xlu0 %873, %v28_v3   ;;  %169 = vperm.xlu1 %875, %v29_v2   ;;  %v71_v24 = vrot.slane %v46_v22, %v70_v19  ;;  %v75_v25 = vrot.slane %v46_v22, %v74_v20  ;;  %v79_v26 = vrot.slane %v46_v22, %v78_v21 }
   0x8   :  { %v83_v31 = vrot.slane %v46_v22, %v82_v23  ;;  %v175_v35 = vrot.slane %v46_v22, %v174_v27  ;;  %v183_v36 = vrot.slane %v46_v22, %v182_v28  ;;  %v179_v37 = vrot.slane %v46_v22, %v178_v29 }
   0x9   :  { %v91_v32 = vrot.slane %v71_v24, %v70_v19  ;;  %v95_v33 = vrot.slane %v75_v25, %v70_v19  ;;  %v1049_v34 = vrot.slane %v79_v26, %v70_v19  ;;  %v187_v38 = vrot.slane %v46_v22, %v186_v30 }
   0xa   :  { %v1051_v39 = vrot.slane %v83_v31, %v70_v19  ;;  %v1054_v45 = vrot.slane %v175_v35, %v174_v27  ;;  %v1056_v46 = vrot.slane %v183_v36, %v174_v27  ;;  %v1058_v47 = vrot.slane %v179_v37, %v174_v27 }
   0xb   :  { %54 = vperm.xlu0 %873, %v27_v5   ;;  %876 = vset.pattern.permute.xlu1 %v959_v0  ;;  %v1060_v48 = vrot.slane %v187_v38, %v174_v27 }
   0xc   :  { %132 = vperm.xlu1 %876, %v38_v6  }
   0xf   :  { %877 = vset.pattern.permute.xlu0 %v960_v4 }
  0x10   :  { %165 = vperm.xlu0 %877, %v28_v3   ;;  %49 = vperm.xlu1 %876, %v26_v7  }
  0x14   :  { %161 = vperm.xlu0 %877, %v27_v5   ;;  %127 = vperm.xlu1 %876, %v37_v8  }
  0x18   :  { %157 = vperm.xlu0 %877, %v26_v7   ;;  %122 = vperm.xlu1 %876, %v36_v9  }
  0x1c   :  { %878 = vset.pattern.permute.xlu0 %v959_v0  ;;  %273 = vperm.xlu1 %876, %v43_v10  }
  0x1d   :  { %268 = vperm.xlu0 %878, %v42_v15  }
  0x20   :  { %263 = vperm.xlu1 %876, %v41_v11  }
  0x21   :  { %485 = vperm.xlu0 %878, %v44_v16  }
  0x24   :  { %258 = vperm.xlu1 %876, %v40_v12  }
  0x28   :  { %490 = vperm.xlu1 %876, %v45_v13  }
  0x7d   :  { %v138_v40 = vpop.permute.xlu1 %137 }
  0x7e   :  { %v65_v41 = vpop.permute.xlu0 %64 }
  0x7f   :  { %v116_v42 = vmul.f32 %v91_v32, %v65_v41  ;;  %v117_v43 = vmul.f32 %v95_v33, %v65_v41  ;;  %v118_v44 = vmul.f32 %v1049_v34, %v65_v41  ;;  %v119_v49 = vmul.f32 %v1051_v39, %v65_v41 }
  0x81   :  { %v152_v51 = vadd.f32 %v138_v40, %v116_v42  ;;  %v154_v52 = vadd.f32 %v138_v40, %v118_v44  ;;  %v153_v54 = vadd.f32 %v138_v40, %v117_v43  ;;  %v155_v59 = vadd.f32 %v138_v40, %v119_v49 }
  0x82   :  { %v60_v50 = vpop.permute.xlu0 %59  ;;  %v170_v53 = vpop.permute.xlu1 %169 }
  0x83   :  { %v220_v55 = vmul.f32 %v1054_v45, %v170_v53  ;;  %v222_v56 = vmul.f32 %v1056_v46, %v170_v53  ;;  %v221_v57 = vmul.f32 %v1058_v47, %v170_v53  ;;  %v223_v58 = vmul.f32 %v1060_v48, %v170_v53 }
  0x84   :  { %v112_v2 = vmul.f32 %v91_v32, %v60_v50  ;;  %v113_v3 = vmul.f32 %v95_v33, %v60_v50  ;;  %v114_v4 = vmul.f32 %v1049_v34, %v60_v50  ;;  %v115_v5 = vmul.f32 %v1051_v39, %v60_v50 }
  0x85   :  { %v236_v60 = vadd.f32 %v220_v55, %v152_v51  ;;  %v238_v61 = vadd.f32 %v222_v56, %v154_v52  ;;  %v237_v63 = vadd.f32 %v221_v57, %v153_v54  ;;  %v239_v0 = vadd.f32 %v223_v58, %v155_v59 }
  0x86   :  { %v55_v62 = vpop.permute.xlu0 %54 }
  0x87   :  { %879 = vtanh.f32 %v236_v60  ;;  %v133_v1 = vpop.permute.xlu1 %132  ;;  %v108_v16 = vmul.f32 %v91_v32, %v55_v62  ;;  %v109_v17 = vmul.f32 %v95_v33, %v55_v62  ;;  %v110_v19 = vmul.f32 %v1049_v34, %v55_v62 }
  0x88   :  { %881 = vtanh.f32 %v238_v61  ;;  %v148_v6 = vadd.f32 %v133_v1, %v112_v2  ;;  %v149_v7 = vadd.f32 %v133_v1, %v113_v3  ;;  %v150_v8 = vadd.f32 %v133_v1, %v114_v4 }
  0x89   :  { %883 = vtanh.f32 %v237_v63  ;;  %v151_v18 = vadd.f32 %v133_v1, %v115_v5  ;;  %v111_v23 = vmul.f32 %v1051_v39, %v55_v62 }
  0x8a   :  { %885 = vtanh.f32 %v239_v0 }
  0x8b   :  { %v166_v9 = vpop.permute.xlu0 %165  ;;  %v50_v15 = vpop.permute.xlu1 %49 }
  0x8c   :  { %v216_v10 = vmul.f32 %v1054_v45, %v166_v9  ;;  %v217_v11 = vmul.f32 %v1058_v47, %v166_v9  ;;  %v218_v12 = vmul.f32 %v1056_v46, %v166_v9  ;;  %v219_v13 = vmul.f32 %v1060_v48, %v166_v9 }
  0x8d   :  { %v104_v25 = vmul.f32 %v91_v32, %v50_v15  ;;  %v105_v26 = vmul.f32 %v95_v33, %v50_v15  ;;  %v106_v38 = vmul.f32 %v1049_v34, %v50_v15  ;;  %v107_v33 = vmul.f32 %v1051_v39, %v50_v15 }
  0x8e   :  { %v232_v20 = vadd.f32 %v216_v10, %v148_v6  ;;  %v233_v21 = vadd.f32 %v217_v11, %v149_v7  ;;  %v234_v22 = vadd.f32 %v218_v12, %v150_v8  ;;  %v235_v24 = vadd.f32 %v219_v13, %v151_v18  ;;  %v30_v7 = vld [vmem:[%s1386_s3] sm:$0xff]  ;;  %v31_v10 = vld [vmem:[%s1386_s3 + $0x8] sm:$0xff]  ;;  %v32_v11 = vld [vmem:[%s1386_s3 + $0x10] sm:$0xff] }
  0x8f   :  { %v162_v27 = vpop.permute.xlu0 %161  ;;  %v128_v31 = vpop.permute.xlu1 %127  ;;  %v33_v12 = vld [vmem:[%s1386_s3 + $0x18] sm:$0xff] }
  0x90   :  { %887 = vtanh.f32 %v232_v20  ;;  %v212_v28 = vmul.f32 %v1054_v45, %v162_v27  ;;  %v213_v29 = vmul.f32 %v1058_v47, %v162_v27  ;;  %v214_v30 = vmul.f32 %v1056_v46, %v162_v27 }
  0x91   :  { %889 = vtanh.f32 %v233_v21  ;;  %v215_v35 = vmul.f32 %v1060_v48, %v162_v27  ;;  %v144_v36 = vadd.f32 %v128_v31, %v108_v16  ;;  %v145_v37 = vadd.f32 %v128_v31, %v109_v17 }
  0x92   :  { %891 = vtanh.f32 %v234_v22  ;;  %v146_v40 = vadd.f32 %v128_v31, %v110_v19  ;;  %v147_v32 = vadd.f32 %v128_v31, %v111_v23 }
  0x93   :  { %893 = vtanh.f32 %v235_v24  ;;  %v228_v41 = vadd.f32 %v212_v28, %v144_v36  ;;  %v229_v42 = vadd.f32 %v213_v29, %v145_v37  ;;  %v158_v43 = vpop.permute.xlu0 %157  ;;  %v123_v52 = vpop.permute.xlu1 %122 }
  0x94   :  { %v230_v44 = vadd.f32 %v214_v30, %v146_v40  ;;  %v231_v49 = vadd.f32 %v215_v35, %v147_v32  ;;  %v208_v50 = vmul.f32 %v1054_v45, %v158_v43  ;;  %v209_v51 = vmul.f32 %v1058_v47, %v158_v43  ;;  %v880_v53 = vpop.eup %879 }
  0x95   :  { %895 = vtanh.f32 %v228_v41  ;;  %v210_v54 = vmul.f32 %v1056_v46, %v158_v43  ;;  %v211_v34 = vmul.f32 %v1060_v48, %v158_v43  ;;  %v140_v55 = vadd.f32 %v123_v52, %v104_v25  ;;  %v882_v56 = vpop.eup %881 }
  0x96   :  { %897 = vtanh.f32 %v229_v42  ;;  %v141_v39 = vadd.f32 %v123_v52, %v105_v26  ;;  %v142_v57 = vadd.f32 %v123_v52, %v106_v38  ;;  %v143_v58 = vadd.f32 %v123_v52, %v107_v33  ;;  %v884_v59 = vpop.eup %883 }
  0x97   :  { %899 = vtanh.f32 %v230_v44  ;;  %v224_v60 = vadd.f32 %v208_v50, %v140_v55  ;;  %v886_v61 = vpop.eup %885  ;;  %313 = vmatprep.subr.mxu0 %v884_v59  ;;  %v274_v13 = vpop.permute.xlu1 %273 }
  0x98   :  { %901 = vtanh.f32 %v231_v49  ;;  %v225_v45 = vadd.f32 %v209_v51, %v141_v39  ;;  %v226_v47 = vadd.f32 %v210_v54, %v142_v57  ;;  %v227_v62 = vadd.f32 %v211_v34, %v143_v58  ;;  %402 = vmatprep.subr.mxu1 %v886_v61  ;;  %314 = vmatpush1.msra.mxu0 %v880_v53  ;;  %v269_v29 = vpop.permute.xlu0 %268 }
  0x99   :  { %903 = vtanh.f32 %v224_v60  ;;  %403 = vmatpush1.msra.mxu1 %v882_v56 }
  0x9a   :  { %905 = vtanh.f32 %v225_v45 }
  0x9b   :  { %907 = vtanh.f32 %v226_v47  ;;  %v264_v15 = vpop.permute.xlu1 %263 }
  0x9c   :  { %909 = vtanh.f32 %v227_v62 }
  0x9d   :  { %v888_v46 = vpop.eup %887 }
  0x9e   :  { %v890_v48 = vpop.eup %889 }
  0x9f   :  { %v892_v63 = vpop.eup %891  ;;  %315 = vmatprep.subr.mxu0 %v890_v48  ;;  %v259_v21 = vpop.permute.xlu1 %258 }
  0xa0   :  { %v894_v0 = vpop.eup %893  ;;  %316 = vmatpush1.msra.mxu0 %v888_v46 }
  0xa1   :  { %404 = vmatprep.subr.mxu1 %v894_v0  ;;  %v34_v0 = vld [vmem:[%s1387_s5] sm:$0xff] }
  0xa2   :  { %v896_v1 = vpop.eup %895  ;;  %405 = vmatpush1.msra.mxu1 %v892_v63 }
  0xa3   :  { %v898_v2 = vpop.eup %897 }
  0xa4   :  { %v900_v3 = vpop.eup %899  ;;  %317 = vmatprep.subr.mxu0 %v898_v2 }
  0xa5   :  { %v902_v4 = vpop.eup %901  ;;  %318 = vmatpush1.msra.mxu0 %v896_v1 }
  0xa6   :  { %v904_v5 = vpop.eup %903  ;;  %406 = vmatprep.subr.mxu1 %v902_v4  ;;  %v486_v4 = vpop.permute.xlu0 %485 }
  0xa7   :  { %v906_v6 = vpop.eup %905  ;;  %407 = vmatpush1.msra.mxu1 %v900_v3  ;;  %v35_v3 = vld [vmem:[%s1387_s5 + $0x8] sm:$0xff] }
  0xa8   :  { %v908_v8 = vpop.eup %907  ;;  %319 = vmatprep.subr.mxu0 %v906_v6 }
  0xa9   :  { %v910_v9 = vpop.eup %909  ;;  %320 = vmatpush1.msra.mxu0 %v904_v5 }
  0xaa   :  { %408 = vmatprep.subr.mxu1 %v910_v9  ;;  %858 = vmatmul.mubr.msk.f32.vlgmr.msra.gmra.mxu0 %vm276_vm0, %v30_v7  ;;  %v491_v9 = vpop.permute.xlu1 %490 }
  0xab   :  { %409 = vmatpush1.msra.mxu1 %v908_v8  ;;  %359 = vmatprep.mubr.f32.mxu0 %v961_v14 }
  0xac   :  { %862 = vmatmul.mubr.msk.f32.vlgmr.msra.gmra.mxu1 %vm276_vm0, %v30_v7 }
  0xad   :  { %448 = vmatprep.mubr.f32.mxu1 %v961_v14 }
  0xae   :  { %859 = vmatmul.mubr.msk.f32.gmra.mxu0 %vm276_vm0, %v31_v10 }
  0xaf   :  { %365 = vmatprep.mubr.f32.mxu0 %v961_v14 }
  0xb0   :  { %863 = vmatmul.mubr.msk.f32.gmra.mxu1 %vm276_vm0, %v31_v10 }
  0xb1   :  { %454 = vmatprep.mubr.f32.mxu1 %v961_v14 }
  0xb2   :  { %860 = vmatmul.mubr.msk.f32.gmra.mxu0 %vm276_vm0, %v32_v11 }
  0xb3   :  { %371 = vmatprep.mubr.f32.mxu0 %v961_v14 }
  0xb4   :  { %864 = vmatmul.mubr.msk.f32.gmra.mxu1 %vm276_vm0, %v32_v11 }
  0xb5   :  { %460 = vmatprep.mubr.f32.mxu1 %v961_v14 }
  0xb6   :  { %861 = vmatmul.mubr.msk.f32.gmra.mxu0 %vm276_vm0, %v33_v12 }
  0xb7   :  { %563 = vmatprep.mubr.f32.mxu0 %v961_v14 }
  0xb8   :  { %865 = vmatmul.mubr.msk.f32.gmra.mxu1 %vm276_vm0, %v33_v12 }
  0xb9   :  { %640 = vmatprep.mubr.f32.mxu1 %v961_v14 }
 0x16a   :  { %v355_v16 = vpop.f32.mrf.mxu0 }
 0x16b   :  { %v356_v24 = vadd.f32 %v355_v16, %v259_v21 }
 0x16c   :  { %v444_v17 = vpop.f32.mrf.mxu1  ;;  %v357_v18 = vpop.f32.mrf.mxu0 }
 0x16d   :  { %v358_v25 = vadd.f32 %v357_v18, %v259_v21  ;;  %911 = vtanh.f32 %v356_v24  ;;  %v445_v34 = vadd.f32 %v444_v17, %v259_v21 }
 0x16e   :  { %v446_v19 = vpop.f32.mrf.mxu1  ;;  %v361_v20 = vpop.f32.mrf.mxu0 }
 0x16f   :  { %v362_v28 = vadd.f32 %v361_v20, %v264_v15  ;;  %913 = vtanh.f32 %v358_v25  ;;  %v447_v54 = vadd.f32 %v446_v19, %v259_v21 }
 0x170   :  { %v450_v22 = vpop.f32.mrf.mxu1  ;;  %v363_v23 = vpop.f32.mrf.mxu0 }
 0x171   :  { %915 = vtanh.f32 %v362_v28  ;;  %v364_v51 = vadd.f32 %v363_v23, %v264_v15  ;;  %v451_v53 = vadd.f32 %v450_v22, %v264_v15 }
 0x172   :  { %v452_v26 = vpop.f32.mrf.mxu1  ;;  %v367_v27 = vpop.f32.mrf.mxu0 }
 0x173   :  { %v368_v49 = vadd.f32 %v367_v27, %v269_v29  ;;  %v453_v52 = vadd.f32 %v452_v26, %v264_v15 }
 0x174   :  { %v456_v30 = vpop.f32.mrf.mxu1  ;;  %v369_v31 = vpop.f32.mrf.mxu0 }
 0x175   :  { %v457_v35 = vadd.f32 %v456_v30, %v269_v29  ;;  %v370_v36 = vadd.f32 %v369_v31, %v269_v29 }
 0x176   :  { %v458_v37 = vpop.f32.mrf.mxu1  ;;  %v373_v38 = vpop.f32.mrf.mxu0 }
 0x177   :  { %v459_v40 = vadd.f32 %v458_v37, %v269_v29  ;;  %v374_v32 = vadd.f32 %v373_v38, %v274_v13  ;;  %917 = vtanh.f32 %v457_v35 }
 0x178   :  { %v462_v33 = vpop.f32.mrf.mxu1  ;;  %v375_v41 = vpop.f32.mrf.mxu0  ;;  %919 = vtanh.f32 %v370_v36 }
 0x179   :  { %v376_v42 = vadd.f32 %v375_v41, %v274_v13  ;;  %921 = vtanh.f32 %v459_v40  ;;  %v463_v43 = vadd.f32 %v462_v33, %v274_v13 }
 0x17a   :  { %v464_v44 = vpop.f32.mrf.mxu1  ;;  %923 = vtanh.f32 %v374_v32  ;;  %v912_v55 = vpop.eup %911 }
 0x17b   :  { %v465_v50 = vadd.f32 %v464_v44, %v274_v13  ;;  %925 = vtanh.f32 %v376_v42 }
 0x17c   :  { %v914_v56 = vpop.eup %913 }
 0x17d   :  { %927 = vtanh.f32 %v465_v50 }
 0x17e   :  { %929 = vtanh.f32 %v463_v43  ;;  %v916_v39 = vpop.eup %915 }
 0x17f   :  { %931 = vtanh.f32 %v368_v49 }
 0x180   :  { %933 = vtanh.f32 %v364_v51 }
 0x181   :  { %935 = vtanh.f32 %v453_v52 }
 0x182   :  { %937 = vtanh.f32 %v451_v53 }
 0x183   :  { %939 = vtanh.f32 %v447_v54 }
 0x184   :  { %941 = vtanh.f32 %v445_v34  ;;  %v918_v57 = vpop.eup %917 }
 0x185   :  { %v920_v58 = vpop.eup %919 }
 0x186   :  { %v922_v59 = vpop.eup %921 }
 0x187   :  { %v924_v60 = vpop.eup %923 }
 0x188   :  { %v926_v61 = vpop.eup %925 }
 0x189   :  { %523 = vmatprep.subr.mxu0 %v926_v61 }
 0x18a   :  { %v928_v45 = vpop.eup %927  ;;  %524 = vmatpush1.msra.mxu0 %v924_v60 }
 0x18b   :  { %v930_v47 = vpop.eup %929  ;;  %600 = vmatprep.subr.mxu1 %v928_v45  ;;  %525 = vmatprep.subr.mxu0 %v920_v58 }
 0x18c   :  { %v932_v62 = vpop.eup %931  ;;  %601 = vmatpush1.msra.mxu1 %v930_v47 }
 0x18d   :  { %v934_v46 = vpop.eup %933  ;;  %602 = vmatprep.subr.mxu1 %v922_v59  ;;  %526 = vmatpush1.msra.mxu0 %v932_v62 }
 0x18e   :  { %v936_v48 = vpop.eup %935  ;;  %603 = vmatpush1.msra.mxu1 %v918_v57  ;;  %527 = vmatprep.subr.mxu0 %v934_v46 }
 0x18f   :  { %v938_v63 = vpop.eup %937  ;;  %604 = vmatprep.subr.mxu1 %v936_v48  ;;  %528 = vmatpush1.msra.mxu0 %v916_v39 }
 0x190   :  { %v940_v1 = vpop.eup %939  ;;  %605 = vmatpush1.msra.mxu1 %v938_v63  ;;  %529 = vmatprep.subr.mxu0 %v914_v56 }
 0x191   :  { %v942_v2 = vpop.eup %941  ;;  %606 = vmatprep.subr.mxu1 %v940_v1  ;;  %530 = vmatpush1.msra.mxu0 %v912_v55 }
 0x192   :  { %607 = vmatpush1.msra.mxu1 %v942_v2  ;;  %866 = vmatmul.mubr.msk.f32.vlgmr.msra.gmra.mxu0 %vm276_vm0, %v34_v0 }
 0x193   :  { %868 = vmatmul.mubr.msk.f32.vlgmr.msra.gmra.mxu1 %vm276_vm0, %v34_v0  ;;  %569 = vmatprep.mubr.f32.mxu0 %v961_v14 }
 0x194   :  { %646 = vmatprep.mubr.f32.mxu1 %v961_v14 }
 0x196   :  { %867 = vmatmul.mubr.msk.f32.gmra.mxu0 %vm276_vm0, %v35_v3 }
 0x197   :  { %869 = vmatmul.mubr.msk.f32.gmra.mxu1 %vm276_vm0, %v35_v3 }
 0x252   :  { %v565_v5 = vpop.f32.mrf.mxu0 }
 0x253   :  { %v566_v6 = vadd.f32 %v565_v5, %v486_v4  ;;  %v642_v18 = vpop.f32.mrf.mxu1 }
 0x254   :  { %v567_v7 = vpop.f32.mrf.mxu0  ;;  %v643_v21 = vadd.f32 %v642_v18, %v486_v4 }
 0x255   :  { %943 = vtanh.f32 %v566_v6  ;;  %v568_v8 = vadd.f32 %v567_v7, %v486_v4  ;;  %v644_v19 = vpop.f32.mrf.mxu1 }
 0x256   :  { %v571_v10 = vpop.f32.mrf.mxu0  ;;  %v645_v22 = vadd.f32 %v644_v19, %v486_v4 }
 0x257   :  { %945 = vtanh.f32 %v568_v8  ;;  %v572_v11 = vadd.f32 %v571_v10, %v491_v9  ;;  %v648_v20 = vpop.f32.mrf.mxu1 }
 0x258   :  { %v573_v12 = vpop.f32.mrf.mxu0  ;;  %v649_v24 = vadd.f32 %v648_v20, %v491_v9 }
 0x259   :  { %947 = vtanh.f32 %v572_v11  ;;  %v574_v13 = vadd.f32 %v573_v12, %v491_v9  ;;  %v650_v23 = vpop.f32.mrf.mxu1 }
 0x25a   :  { %v651_v25 = vadd.f32 %v650_v23, %v491_v9 }
 0x25b   :  { %949 = vtanh.f32 %v574_v13 }
 0x25c   :  { %951 = vtanh.f32 %v643_v21 }
 0x25d   :  { %953 = vtanh.f32 %v645_v22 }
 0x25e   :  { %955 = vtanh.f32 %v649_v24 }
 0x25f   :  { %957 = vtanh.f32 %v651_v25 }
 0x262   :  { %v944_v15 = vpop.eup %943 }
 0x263   :  { %661 = vxpose.xlu0.b32.start [1/2] (short) %v944_v15, 128 }
 0x264   :  { %v946_v14 = vpop.eup %945 }
 0x265   :  { %693 = vxpose.xlu1.b32.start [1/2] (short) %v946_v14, 128 }
 0x266   :  { %v948_v16 = vpop.eup %947 }
 0x267   :  { %662 = vxpose.xlu0.b32.end [2/2] (short) %v948_v16, 128 }
 0x268   :  { %v950_v17 = vpop.eup %949 }
 0x269   :  { %694 = vxpose.xlu1.b32.end [2/2] (short) %v950_v17, 128  ;;  %v952_v26 = vpop.eup %951 }
 0x26a   :  { %v954_v27 = vpop.eup %953 }
 0x26b   :  { %v956_v28 = vpop.eup %955 }
 0x26c   :  { %v958_v29 = vpop.eup %957 }
 0x2a0   :  { %725 = vxpose.xlu0.b32.start [1/2] (short) %v952_v26, 128 }
 0x2a2   :  { %757 = vxpose.xlu1.b32.start [1/2] (short) %v954_v27, 128 }
 0x2a4   :  { %726 = vxpose.xlu0.b32.end [2/2] (short) %v956_v28, 128 }
 0x2a6   :  { %758 = vxpose.xlu1.b32.end [2/2] (short) %v958_v29, 128 }
 0x2df   :  { %v677_v30 = vpop.trf.xlu0 }
 0x2e0   :  { %790 = vst.msk [vmem:[%s1388_s7] sm:$0xff] %vm789_vm1, %v677_v30 }
 0x2e1   :  { %v709_v31 = vpop.trf.xlu1 }
 0x2e2   :  { %806 = vst.msk [vmem:[%s1388_s7 + $0x80] sm:$0xff] %vm789_vm1, %v709_v31 }
 0x2e3   :  { %v678_v35 = vpop.trf.xlu0 }
 0x2e4   :  { %791 = vst.msk [vmem:[%s1388_s7 + $0x8] sm:$0xff] %vm789_vm1, %v678_v35 }
 0x2e5   :  { %v710_v36 = vpop.trf.xlu1 }
 0x2e6   :  { %807 = vst.msk [vmem:[%s1388_s7 + $0x88] sm:$0xff] %vm789_vm1, %v710_v36 }
 0x2e7   :  { %v679_v37 = vpop.trf.xlu0 }
 0x2e8   :  { %792 = vst.msk [vmem:[%s1388_s7 + $0x10] sm:$0xff] %vm789_vm1, %v679_v37 }
 0x2e9   :  { %v711_v38 = vpop.trf.xlu1 }
 0x2ea   :  { %808 = vst.msk [vmem:[%s1388_s7 + $0x90] sm:$0xff] %vm789_vm1, %v711_v38 }
 0x2eb   :  { %v680_v40 = vpop.trf.xlu0 }
 0x2ec   :  { %793 = vst.msk [vmem:[%s1388_s7 + $0x18] sm:$0xff] %vm789_vm1, %v680_v40 }
 0x2ed   :  { %v712_v32 = vpop.trf.xlu1 }
 0x2ee   :  { %809 = vst.msk [vmem:[%s1388_s7 + $0x98] sm:$0xff] %vm789_vm1, %v712_v32 }
 0x2ef   :  { %v681_v33 = vpop.trf.xlu0 }
 0x2f0   :  { %794 = vst.msk [vmem:[%s1388_s7 + $0x20] sm:$0xff] %vm789_vm1, %v681_v33 }
 0x2f1   :  { %v713_v41 = vpop.trf.xlu1 }
 0x2f2   :  { %810 = vst.msk [vmem:[%s1388_s7 + $0xa0] sm:$0xff] %vm789_vm1, %v713_v41 }
 0x2f3   :  { %v682_v42 = vpop.trf.xlu0 }
 0x2f4   :  { %795 = vst.msk [vmem:[%s1388_s7 + $0x28] sm:$0xff] %vm789_vm1, %v682_v42 }
 0x2f5   :  { %v714_v43 = vpop.trf.xlu1 }
 0x2f6   :  { %811 = vst.msk [vmem:[%s1388_s7 + $0xa8] sm:$0xff] %vm789_vm1, %v714_v43 }
 0x2f7   :  { %v683_v44 = vpop.trf.xlu0 }
 0x2f8   :  { %796 = vst.msk [vmem:[%s1388_s7 + $0x30] sm:$0xff] %vm789_vm1, %v683_v44 }
 0x2f9   :  { %v715_v49 = vpop.trf.xlu1 }
 0x2fa   :  { %812 = vst.msk [vmem:[%s1388_s7 + $0xb0] sm:$0xff] %vm789_vm1, %v715_v49 }
 0x2fb   :  { %v684_v50 = vpop.trf.xlu0 }
 0x2fc   :  { %797 = vst.msk [vmem:[%s1388_s7 + $0x38] sm:$0xff] %vm789_vm1, %v684_v50 }
 0x2fd   :  { %v716_v51 = vpop.trf.xlu1 }
 0x2fe   :  { %813 = vst.msk [vmem:[%s1388_s7 + $0xb8] sm:$0xff] %vm789_vm1, %v716_v51 }
 0x2ff   :  { %v685_v52 = vpop.trf.xlu0 }
 0x300   :  { %798 = vst.msk [vmem:[%s1388_s7 + $0x40] sm:$0xff] %vm789_vm1, %v685_v52 }
 0x301   :  { %v717_v53 = vpop.trf.xlu1 }
 0x302   :  { %814 = vst.msk [vmem:[%s1388_s7 + $0xc0] sm:$0xff] %vm789_vm1, %v717_v53 }
 0x303   :  { %v686_v54 = vpop.trf.xlu0 }
 0x304   :  { %799 = vst.msk [vmem:[%s1388_s7 + $0x48] sm:$0xff] %vm789_vm1, %v686_v54 }
 0x305   :  { %v718_v34 = vpop.trf.xlu1 }
 0x306   :  { %815 = vst.msk [vmem:[%s1388_s7 + $0xc8] sm:$0xff] %vm789_vm1, %v718_v34 }
 0x307   :  { %v687_v55 = vpop.trf.xlu0 }
 0x308   :  { %800 = vst.msk [vmem:[%s1388_s7 + $0x50] sm:$0xff] %vm789_vm1, %v687_v55 }
 0x309   :  { %v719_v56 = vpop.trf.xlu1 }
 0x30a   :  { %816 = vst.msk [vmem:[%s1388_s7 + $0xd0] sm:$0xff] %vm789_vm1, %v719_v56 }
 0x30b   :  { %v688_v39 = vpop.trf.xlu0 }
 0x30c   :  { %801 = vst.msk [vmem:[%s1388_s7 + $0x58] sm:$0xff] %vm789_vm1, %v688_v39 }
 0x30d   :  { %v720_v57 = vpop.trf.xlu1 }
 0x30e   :  { %817 = vst.msk [vmem:[%s1388_s7 + $0xd8] sm:$0xff] %vm789_vm1, %v720_v57 }
 0x30f   :  { %v689_v58 = vpop.trf.xlu0 }
 0x310   :  { %802 = vst.msk [vmem:[%s1388_s7 + $0x60] sm:$0xff] %vm789_vm1, %v689_v58 }
 0x311   :  { %v721_v59 = vpop.trf.xlu1 }
 0x312   :  { %818 = vst.msk [vmem:[%s1388_s7 + $0xe0] sm:$0xff] %vm789_vm1, %v721_v59 }
 0x313   :  { %v690_v60 = vpop.trf.xlu0 }
 0x314   :  { %803 = vst.msk [vmem:[%s1388_s7 + $0x68] sm:$0xff] %vm789_vm1, %v690_v60 }
 0x315   :  { %v722_v61 = vpop.trf.xlu1 }
 0x316   :  { %819 = vst.msk [vmem:[%s1388_s7 + $0xe8] sm:$0xff] %vm789_vm1, %v722_v61 }
 0x317   :  { %v691_v45 = vpop.trf.xlu0 }
 0x318   :  { %804 = vst.msk [vmem:[%s1388_s7 + $0x70] sm:$0xff] %vm789_vm1, %v691_v45 }
 0x319   :  { %v723_v47 = vpop.trf.xlu1 }
 0x31a   :  { %820 = vst.msk [vmem:[%s1388_s7 + $0xf0] sm:$0xff] %vm789_vm1, %v723_v47 }
 0x31b   :  { %v692_v62 = vpop.trf.xlu0 }
 0x31c   :  { %805 = vst.msk [vmem:[%s1388_s7 + $0x78] sm:$0xff] %vm789_vm1, %v692_v62 }
 0x31d   :  { %v724_v46 = vpop.trf.xlu1 }
 0x31e   :  { %821 = vst.msk [vmem:[%s1388_s7 + $0xf8] sm:$0xff] %vm789_vm1, %v724_v46 }
 0x31f   :  { %v741_v48 = vpop.trf.xlu0 }
 0x320   :  { %822 = vst.msk [vmem:[%s1388_s7 + $0x100] sm:$0xff] %vm789_vm1, %v741_v48 }
 0x321   :  { %v773_v63 = vpop.trf.xlu1 }
 0x322   :  { %838 = vst.msk [vmem:[%s1388_s7 + $0x180] sm:$0xff] %vm789_vm1, %v773_v63 }
 0x323   :  { %v742_v0 = vpop.trf.xlu0 }
 0x324   :  { %823 = vst.msk [vmem:[%s1388_s7 + $0x108] sm:$0xff] %vm789_vm1, %v742_v0 }
 0x325   :  { %v774_v1 = vpop.trf.xlu1 }
 0x326   :  { %839 = vst.msk [vmem:[%s1388_s7 + $0x188] sm:$0xff] %vm789_vm1, %v774_v1 }
 0x327   :  { %v743_v2 = vpop.trf.xlu0 }
 0x328   :  { %824 = vst.msk [vmem:[%s1388_s7 + $0x110] sm:$0xff] %vm789_vm1, %v743_v2 }
 0x329   :  { %v775_v3 = vpop.trf.xlu1 }
 0x32a   :  { %840 = vst.msk [vmem:[%s1388_s7 + $0x190] sm:$0xff] %vm789_vm1, %v775_v3 }
 0x32b   :  { %v744_v4 = vpop.trf.xlu0 }
 0x32c   :  { %825 = vst.msk [vmem:[%s1388_s7 + $0x118] sm:$0xff] %vm789_vm1, %v744_v4 }
 0x32d   :  { %v776_v5 = vpop.trf.xlu1 }
 0x32e   :  { %841 = vst.msk [vmem:[%s1388_s7 + $0x198] sm:$0xff] %vm789_vm1, %v776_v5 }
 0x32f   :  { %v745_v6 = vpop.trf.xlu0 }
 0x330   :  { %826 = vst.msk [vmem:[%s1388_s7 + $0x120] sm:$0xff] %vm789_vm1, %v745_v6 }
 0x331   :  { %v777_v7 = vpop.trf.xlu1 }
 0x332   :  { %842 = vst.msk [vmem:[%s1388_s7 + $0x1a0] sm:$0xff] %vm789_vm1, %v777_v7 }
 0x333   :  { %v746_v8 = vpop.trf.xlu0 }
 0x334   :  { %827 = vst.msk [vmem:[%s1388_s7 + $0x128] sm:$0xff] %vm789_vm1, %v746_v8 }
 0x335   :  { %v778_v9 = vpop.trf.xlu1 }
 0x336   :  { %843 = vst.msk [vmem:[%s1388_s7 + $0x1a8] sm:$0xff] %vm789_vm1, %v778_v9 }
 0x337   :  { %v747_v10 = vpop.trf.xlu0 }
 0x338   :  { %828 = vst.msk [vmem:[%s1388_s7 + $0x130] sm:$0xff] %vm789_vm1, %v747_v10 }
 0x339   :  { %v779_v11 = vpop.trf.xlu1 }
 0x33a   :  { %844 = vst.msk [vmem:[%s1388_s7 + $0x1b0] sm:$0xff] %vm789_vm1, %v779_v11 }
 0x33b   :  { %v748_v12 = vpop.trf.xlu0 }
 0x33c   :  { %829 = vst.msk [vmem:[%s1388_s7 + $0x138] sm:$0xff] %vm789_vm1, %v748_v12 }
 0x33d   :  { %v780_v13 = vpop.trf.xlu1 }
 0x33e   :  { %845 = vst.msk [vmem:[%s1388_s7 + $0x1b8] sm:$0xff] %vm789_vm1, %v780_v13 }
 0x33f   :  { %v749_v15 = vpop.trf.xlu0 }
 0x340   :  { %830 = vst.msk [vmem:[%s1388_s7 + $0x140] sm:$0xff] %vm789_vm1, %v749_v15 }
 0x341   :  { %v781_v14 = vpop.trf.xlu1 }
 0x342   :  { %846 = vst.msk [vmem:[%s1388_s7 + $0x1c0] sm:$0xff] %vm789_vm1, %v781_v14 }
 0x343   :  { %v750_v16 = vpop.trf.xlu0 }
 0x344   :  { %831 = vst.msk [vmem:[%s1388_s7 + $0x148] sm:$0xff] %vm789_vm1, %v750_v16 }
 0x345   :  { %v782_v17 = vpop.trf.xlu1 }
 0x346   :  { %847 = vst.msk [vmem:[%s1388_s7 + $0x1c8] sm:$0xff] %vm789_vm1, %v782_v17 }
 0x347   :  { %v751_v18 = vpop.trf.xlu0 }
 0x348   :  { %832 = vst.msk [vmem:[%s1388_s7 + $0x150] sm:$0xff] %vm789_vm1, %v751_v18 }
 0x349   :  { %v783_v19 = vpop.trf.xlu1 }
 0x34a   :  { %848 = vst.msk [vmem:[%s1388_s7 + $0x1d0] sm:$0xff] %vm789_vm1, %v783_v19 }
 0x34b   :  { %v752_v20 = vpop.trf.xlu0 }
 0x34c   :  { %833 = vst.msk [vmem:[%s1388_s7 + $0x158] sm:$0xff] %vm789_vm1, %v752_v20 }
 0x34d   :  { %v784_v21 = vpop.trf.xlu1 }
 0x34e   :  { %849 = vst.msk [vmem:[%s1388_s7 + $0x1d8] sm:$0xff] %vm789_vm1, %v784_v21 }
 0x34f   :  { %v753_v22 = vpop.trf.xlu0 }
 0x350   :  { %834 = vst.msk [vmem:[%s1388_s7 + $0x160] sm:$0xff] %vm789_vm1, %v753_v22 }
 0x351   :  { %v785_v23 = vpop.trf.xlu1 }
 0x352   :  { %850 = vst.msk [vmem:[%s1388_s7 + $0x1e0] sm:$0xff] %vm789_vm1, %v785_v23 }
 0x353   :  { %v754_v24 = vpop.trf.xlu0 }
 0x354   :  { %835 = vst.msk [vmem:[%s1388_s7 + $0x168] sm:$0xff] %vm789_vm1, %v754_v24 }
 0x355   :  { %v786_v25 = vpop.trf.xlu1 }
 0x356   :  { %851 = vst.msk [vmem:[%s1388_s7 + $0x1e8] sm:$0xff] %vm789_vm1, %v786_v25 }
 0x357   :  { %v755_v26 = vpop.trf.xlu0 }
 0x358   :  { %836 = vst.msk [vmem:[%s1388_s7 + $0x170] sm:$0xff] %vm789_vm1, %v755_v26 }
 0x359   :  { %v787_v27 = vpop.trf.xlu1 }
 0x35a   :  { %852 = vst.msk [vmem:[%s1388_s7 + $0x1f0] sm:$0xff] %vm789_vm1, %v787_v27 }
 0x35b   :  { %v756_v28 = vpop.trf.xlu0 }
 0x35c   :  { %837 = vst.msk [vmem:[%s1388_s7 + $0x178] sm:$0xff] %vm789_vm1, %v756_v28 }
 0x35d   :  { %v788_v29 = vpop.trf.xlu1 }
 0x35e   :  { %853 = vst.msk [vmem:[%s1388_s7 + $0x1f8] sm:$0xff] %vm789_vm1, %v788_v29 }

</bundles_post_ra>
